<compile_context>
chip_gen: v7x
topology: tpu7x:2x2x1
jax: 0.10.0
libtpu: 0.0.40
codegen_flags: <defaults>
</compile_context>

<pallas_src>
import jax
import jax.numpy as jnp
from jax.experimental import pallas as pl
from jax.experimental.pallas import tpu as pltpu


# ----------------------------------------------------------------------------
# Kernel
# ----------------------------------------------------------------------------
def _fused_kernel(v_ref, a_ref, wv_ref, wa_ref, b1_ref, w2_ref, b2_ref, out_ref):
    # Inputs arrive as f32 rows; cast to the MXU dtype in-register (VPU cast,
    # hidden under the input DMA).  Accumulation is f32 via
    # preferred_element_type; bias add / ReLU stay f32 (no bf16 VALU on v5e).
    v = v_ref[...].astype(wv_ref.dtype)
    a = a_ref[...].astype(wa_ref.dtype)

    # Folded first layer: h = relu(v @ Wv' + a @ Wa' + b')  (no lane concat).
    h = jnp.dot(v, wv_ref[...], preferred_element_type=jnp.float32)
    h = h + jnp.dot(a, wa_ref[...], preferred_element_type=jnp.float32)
    h = jnp.maximum(h + b1_ref[...], 0.0)

    # Second layer: o = h @ W2 + b2  (narrow output; masked vst is fine here).
    o = jnp.dot(h.astype(w2_ref.dtype), w2_ref[...],
                preferred_element_type=jnp.float32)
    out_ref[...] = (o + b2_ref[...]).astype(out_ref.dtype)


# ----------------------------------------------------------------------------
# Wrapper helpers
# ----------------------------------------------------------------------------
def _round_up(x, m):
    return (x + m - 1) // m * m


def _vmem_limit_bytes():
    """Per-generation VMEM scoped limit (v7x ~48 MiB, v5e/v6e up to ~96 MiB)."""
    cap = None
    try:
        info = pltpu.get_tpu_info()
        cap = getattr(info, "vmem_capacity_bytes", None)
    except Exception:
        cap = None
    if not cap:
        cap = 64 * 1024 * 1024          # conservative (v7x physical VMEM)
    return int(min(cap * 3 // 4, 100 * 1024 * 1024))


def _choose_tm(M, Vd, Ad, H, Od, budget_bytes, tm_target=1024):
    """Largest row tile (multiple of 8, <= tm_target) fitting the VMEM budget,
    capped so the grid has >= 2 steps when there are enough rows (v7x: 2 TCs)."""
    if M >= 16:
        tm_cap = _round_up(pl.cdiv(M, 2), 8)
    else:
        tm_cap = _round_up(max(M, 8), 8)
    tm = min(_round_up(tm_target, 8), tm_cap)

    # Replicated weights (bf16, double-buffered) + biases (f32).
    fixed = 2 * ((Vd + Ad) * H + H * Od) * 2 + 2 * (H + Od) * 4
    while tm > 8:
        per_tile = (2 * tm * (Vd + Ad) * 4     # double-buffered f32 input rows
                    + 2 * tm * Od * 4          # double-buffered f32 output rows
                    + tm * (Vd + Ad) * 2       # in-kernel bf16 copies of inputs
                    + tm * H * 4)              # f32 intermediate h
        if fixed + per_tile <= budget_bytes:
            break
        tm = max(8, _round_up(tm // 2, 8))
    return max(8, _round_up(tm, 8))


# ----------------------------------------------------------------------------
# Forward wrapper
# ----------------------------------------------------------------------------
def multimodal_forward(video, audio, params, *, tm=1024, use_bf16=True):
    """video: (B, T, video_dim), audio: (B, T, audio_dim) -> (B, T, output_dim)."""
    B, T, Vd = video.shape
    _, _, Ad = audio.shape
    wv, bv, wa, ba, w1, b1, w2, b2 = params
    H = wv.shape[1]
    Od = w2.shape[1]

    compute_dtype = jnp.bfloat16 if use_bf16 else jnp.float32

    # ---- Fold the linear prefix (exact up to f32 accumulation order) --------
    w1v = w1[:H]                                   # (H, H)
    w1a = w1[H:]                                   # (H, H)
    wv_c = (wv @ w1v).astype(compute_dtype)        # (Vd, H)
    wa_c = (wa @ w1a).astype(compute_dtype)        # (Ad, H)
    b_f = (bv @ w1v + ba @ w1a + b1)               # (1, H), f32
    w2_c = w2.astype(compute_dtype)                # (H, Od)
    b2_f = b2                                      # (1, Od), f32

    # ---- Row tiling (no padding; Pallas masks the partial last block) -------
    M = B * T
    vmem_limit = _vmem_limit_bytes()
    budget = max(8 * 1024 * 1024, vmem_limit - 8 * 1024 * 1024)
    tm = _choose_tm(M, Vd, Ad, H, Od, budget, tm_target=tm)
    grid = (pl.cdiv(M, tm),)

    v2 = video.reshape(M, Vd)                      # metadata-only reshapes
    a2 = audio.reshape(M, Ad)

    def _full(shape):
        return pl.BlockSpec(shape, lambda i: (0,) * len(shape))

    in_bytes = jnp.dtype(compute_dtype).itemsize
    flops = 2 * M * (Vd + Ad) * H + 2 * M * H * Od
    bytes_accessed = (M * (Vd + Ad) * 4                       # f32 input rows
                      + ((Vd + Ad) * H + H * Od) * in_bytes   # weights
                      + (H + Od) * 4                          # biases
                      + M * Od * 4)                           # f32 output rows

    out = pl.pallas_call(
        _fused_kernel,
        out_shape=jax.ShapeDtypeStruct((M, Od), jnp.float32),
        grid_spec=pltpu.PrefetchScalarGridSpec(
            num_scalar_prefetch=0,
            grid=grid,
            in_specs=[
                pl.BlockSpec((tm, Vd), lambda i: (i, 0)),   # video rows (f32)
                pl.BlockSpec((tm, Ad), lambda i: (i, 0)),   # audio rows (f32)
                _full(wv_c.shape), _full(wa_c.shape), _full(b_f.shape),
                _full(w2_c.shape), _full(b2_f.shape),
            ],
            out_specs=pl.BlockSpec((tm, Od), lambda i: (i, 0)),
        ),
        compiler_params=pltpu.CompilerParams(
            dimension_semantics=("parallel",),
            vmem_limit_bytes=vmem_limit),
        cost_estimate=pl.CostEstimate(
            flops=flops, transcendentals=0, bytes_accessed=bytes_accessed),
    )(v2, a2, wv_c, wa_c, b_f, w2_c, b2_f)

    return out.reshape(B, T, Od)


# ----------------------------------------------------------------------------
# Params + references
# ----------------------------------------------------------------------------
def init_params(key, video_dim, audio_dim, hidden_dim, output_dim):
    """PyTorch Linear-style uniform fan-in init.
    Weights stored as (in_dim, out_dim); biases as (1, out_dim)."""
    ks = jax.random.split(key, 8)

    def lin(kw, kb, fan_in, fan_out):
        bound = 1.0 / jnp.sqrt(fan_in)
        w = jax.random.uniform(kw, (fan_in, fan_out), jnp.float32, -bound, bound)
        b = jax.random.uniform(kb, (1, fan_out), jnp.float32, -bound, bound)
        return w, b

    wv, bv = lin(ks[0], ks[1], video_dim, hidden_dim)
    wa, ba = lin(ks[2], ks[3], audio_dim, hidden_dim)
    w1, b1 = lin(ks[4], ks[5], 2 * hidden_dim, hidden_dim)
    w2, b2 = lin(ks[6], ks[7], hidden_dim, output_dim)
    return (wv, bv, wa, ba, w1, b1, w2, b2)


def _reference(video, audio, params):
    """Exact f32 reference mirroring the PyTorch module."""
    wv, bv, wa, ba, w1, b1, w2, b2 = params
    vo = video @ wv + bv[0]
    ao = audio @ wa + ba[0]
    fused = jnp.concatenate([vo, ao], axis=-1)
    h = jnp.maximum(fused @ w1 + b1[0], 0.0)
    return h @ w2 + b2[0]


def _reference_matched(video, audio, params, use_bf16=True):
    """Reference replicating the kernel's weight folding + in-kernel bf16 casts."""
    wv, bv, wa, ba, w1, b1, w2, b2 = params
    H = wv.shape[1]
    cdt = jnp.bfloat16 if use_bf16 else jnp.float32
    wv_f = (wv @ w1[:H]).astype(cdt)
    wa_f = (wa @ w1[H:]).astype(cdt)
    b_f = bv @ w1[:H] + ba @ w1[H:] + b1
    v = video.astype(cdt)
    a = audio.astype(cdt)
    h = jnp.maximum(
        jnp.dot(v, wv_f, preferred_element_type=jnp.float32)
        + jnp.dot(a, wa_f, preferred_element_type=jnp.float32)
        + b_f[0], 0.0)
    return (jnp.dot(h.astype(cdt), w2.astype(cdt),
                    preferred_element_type=jnp.float32) + b2[0])


# ----------------------------------------------------------------------------
# Self-test
# ----------------------------------------------------------------------------
if __name__ == "__main__":
    B, T = 2, 8
    video_dim, audio_dim, hidden_dim, output_dim = 32, 16, 32, 8

    key = jax.random.PRNGKey(0)
    k_v, k_a, k_p = jax.random.split(key, 3)

    video = jax.random.normal(k_v, (B, T, video_dim), jnp.float32)
    audio = jax.random.normal(k_a, (B, T, audio_dim), jnp.float32)
    params = init_params(k_p, video_dim, audio_dim, hidden_dim, output_dim)

    out = multimodal_forward(video, audio, params)
    out = jax.block_until_ready(out)
    assert out.shape == (B, T, output_dim)

    # Tight check against a reference with identical folding / bf16 casts
    # (validates the Pallas kernel itself).
    ref_match = _reference_matched(video, audio, params, use_bf16=True)
    assert jnp.allclose(out, ref_match, atol=1e-3, rtol=1e-3)

    # Loose check against the exact f32 module semantics (bf16 MXU operands only
    # introduce quantization noise; accumulation is f32).
    ref_exact = _reference(video, audio, params)
    assert jnp.allclose(out, ref_exact, atol=5e-2, rtol=5e-2)

    print("KERNEL_OK")
</pallas_src>

<mosaic_0001>
module attributes {stable_mosaic.version = 11 : i64} {
  func.func @_fused_kernel(%arg0: i32, %arg1: memref<8x32xf32, #tpu.memory_space<vmem>>, %arg2: memref<8x16xf32, #tpu.memory_space<vmem>>, %arg3: memref<32x32xbf16, #tpu.memory_space<vmem>>, %arg4: memref<16x32xbf16, #tpu.memory_space<vmem>>, %arg5: memref<1x32xf32, #tpu.memory_space<vmem>>, %arg6: memref<32x8xbf16, #tpu.memory_space<vmem>>, %arg7: memref<1x8xf32, #tpu.memory_space<vmem>>, %arg8: memref<8x8xf32, #tpu.memory_space<vmem>>) attributes {dimension_semantics = [#tpu.dimension_semantics<parallel>], iteration_bounds = array<i64: 2>, scalar_prefetch = 0 : i64, scratch_operands = 0 : i64, tpu.core_type = #tpu.core_type<tc>, window_params = [{transform_indices = @transform_0, window_bounds = array<i64: 8, 32>}, {transform_indices = @transform_1, window_bounds = array<i64: 8, 16>}, {pipeline_mode = #tpu.pipeline_mode<synchronous>, transform_indices = @transform_2, window_bounds = array<i64: 32, 32>}, {pipeline_mode = #tpu.pipeline_mode<synchronous>, transform_indices = @transform_3, window_bounds = array<i64: 16, 32>}, {pipeline_mode = #tpu.pipeline_mode<synchronous>, transform_indices = @transform_4, window_bounds = array<i64: 1, 32>}, {pipeline_mode = #tpu.pipeline_mode<synchronous>, transform_indices = @transform_5, window_bounds = array<i64: 32, 8>}, {pipeline_mode = #tpu.pipeline_mode<synchronous>, transform_indices = @transform_6, window_bounds = array<i64: 1, 8>}, {transform_indices = @transform_7, window_bounds = array<i64: 8, 8>}]} {
    %c0 = arith.constant 0 : index
    %c0_0 = arith.constant 0 : index
    %0 = vector.load %arg1[%c0, %c0_0] : memref<8x32xf32, #tpu.memory_space<vmem>>, vector<8x32xf32>
    %1 = arith.truncf %0 : vector<8x32xf32> to vector<8x32xbf16>
    %c0_1 = arith.constant 0 : index
    %c0_2 = arith.constant 0 : index
    %2 = vector.load %arg2[%c0_1, %c0_2] : memref<8x16xf32, #tpu.memory_space<vmem>>, vector<8x16xf32>
    %3 = arith.truncf %2 : vector<8x16xf32> to vector<8x16xbf16>
    %c0_3 = arith.constant 0 : index
    %c0_4 = arith.constant 0 : index
    %4 = vector.load %arg3[%c0_3, %c0_4] : memref<32x32xbf16, #tpu.memory_space<vmem>>, vector<32x32xbf16>
    %cst = arith.constant dense<0.000000e+00> : vector<8x32xf32>
    %5 = tpu.matmul %1, %4, %cst {dimension_numbers = #tpu.dot_dimension_numbers<[1], [0], [0], [1], [0, 0, 1, 1], [], []>} : vector<8x32xbf16>, vector<32x32xbf16>, vector<8x32xf32> -> vector<8x32xf32>
    %c0_5 = arith.constant 0 : index
    %c0_6 = arith.constant 0 : index
    %6 = vector.load %arg4[%c0_5, %c0_6] : memref<16x32xbf16, #tpu.memory_space<vmem>>, vector<16x32xbf16>
    %cst_7 = arith.constant dense<0.000000e+00> : vector<8x32xf32>
    %7 = tpu.matmul %3, %6, %cst_7 {dimension_numbers = #tpu.dot_dimension_numbers<[1], [0], [0], [1], [0, 0, 1, 1], [], []>} : vector<8x16xbf16>, vector<16x32xbf16>, vector<8x32xf32> -> vector<8x32xf32>
    %8 = arith.addf %5, %7 : vector<8x32xf32>
    %c0_8 = arith.constant 0 : index
    %c0_9 = arith.constant 0 : index
    %9 = vector.load %arg5[%c0_8, %c0_9] : memref<1x32xf32, #tpu.memory_space<vmem>>, vector<1x32xf32>
    %10 = vector.broadcast %9 : vector<1x32xf32> to vector<8x32xf32>
    %11 = arith.addf %8, %10 : vector<8x32xf32>
    %cst_10 = arith.constant 0.000000e+00 : f32
    %12 = vector.broadcast %cst_10 : f32 to vector<8x32xf32>
    %13 = arith.maximumf %11, %12 : vector<8x32xf32>
    %14 = arith.truncf %13 : vector<8x32xf32> to vector<8x32xbf16>
    %c0_11 = arith.constant 0 : index
    %c0_12 = arith.constant 0 : index
    %15 = vector.load %arg6[%c0_11, %c0_12] : memref<32x8xbf16, #tpu.memory_space<vmem>>, vector<32x8xbf16>
    %cst_13 = arith.constant dense<0.000000e+00> : vector<8x8xf32>
    %16 = tpu.matmul %14, %15, %cst_13 {dimension_numbers = #tpu.dot_dimension_numbers<[1], [0], [0], [1], [0, 0, 1, 1], [], []>} : vector<8x32xbf16>, vector<32x8xbf16>, vector<8x8xf32> -> vector<8x8xf32>
    %c0_14 = arith.constant 0 : index
    %c0_15 = arith.constant 0 : index
    %17 = vector.load %arg7[%c0_14, %c0_15] : memref<1x8xf32, #tpu.memory_space<vmem>>, vector<1x8xf32>
    %18 = vector.broadcast %17 : vector<1x8xf32> to vector<8x8xf32>
    %19 = arith.addf %16, %18 : vector<8x8xf32>
    %c0_16 = arith.constant 0 : index
    %c0_17 = arith.constant 0 : index
    %20 = vector.load %arg8[%c0_16, %c0_17] : memref<8x8xf32, #tpu.memory_space<vmem>>, vector<8x8xf32>
    tpu.vector_store %arg8[%c0_16, %c0_17], %19 {strides = array<i32>} : memref<8x8xf32, #tpu.memory_space<vmem>>, vector<8x8xf32>,
    return
  }
  func.func @transform_0(%arg0: i32) -> (i32, i32) {
    %c0_i32 = arith.constant 0 : i32
    %c0_i32_0 = arith.constant 0 : i32
    return %arg0, %c0_i32 : i32, i32
  }
  func.func @transform_1(%arg0: i32) -> (i32, i32) {
    %c0_i32 = arith.constant 0 : i32
    %c0_i32_0 = arith.constant 0 : i32
    return %arg0, %c0_i32 : i32, i32
  }
  func.func @transform_2(%arg0: i32) -> (i32, i32) {
    %c0_i32 = arith.constant 0 : i32
    %c0_i32_0 = arith.constant 0 : i32
    %c0_i32_1 = arith.constant 0 : i32
    return %c0_i32, %c0_i32_0 : i32, i32
  }
  func.func @transform_3(%arg0: i32) -> (i32, i32) {
    %c0_i32 = arith.constant 0 : i32
    %c0_i32_0 = arith.constant 0 : i32
    %c0_i32_1 = arith.constant 0 : i32
    return %c0_i32, %c0_i32_0 : i32, i32
  }
  func.func @transform_4(%arg0: i32) -> (i32, i32) {
    %c0_i32 = arith.constant 0 : i32
    %c0_i32_0 = arith.constant 0 : i32
    %c0_i32_1 = arith.constant 0 : i32
    return %c0_i32, %c0_i32_0 : i32, i32
  }
  func.func @transform_5(%arg0: i32) -> (i32, i32) {
    %c0_i32 = arith.constant 0 : i32
    %c0_i32_0 = arith.constant 0 : i32
    %c0_i32_1 = arith.constant 0 : i32
    return %c0_i32, %c0_i32_0 : i32, i32
  }
  func.func @transform_6(%arg0: i32) -> (i32, i32) {
    %c0_i32 = arith.constant 0 : i32
    %c0_i32_0 = arith.constant 0 : i32
    %c0_i32_1 = arith.constant 0 : i32
    return %c0_i32, %c0_i32_0 : i32, i32
  }
  func.func @transform_7(%arg0: i32) -> (i32, i32) {
    %c0_i32 = arith.constant 0 : i32
    %c0_i32_0 = arith.constant 0 : i32
    return %arg0, %c0_i32 : i32, i32
  }
}

</mosaic_0001>

<bundles_post_ra>
// kernel: tpu_custom_call.1
= control target key start
LH: loop header
LB: loop body
LE: loop exit
PB: predicated region body
PF: predicated region fallthrough
CT: control target
= control target key end

     0   :  { %12 = vsyncpa [#allocation3], 0  ;;  %s1033_s0 = inlined_call_operand.vmem [shape: f32[16,32], index: 0, kind: input, shape index: {}]   ;;  %s1034_s1 = inlined_call_operand.hbm [shape: f32[16,16], index: 1, kind: input, shape index: {}]   ;;  %s1035_s2 = inlined_call_operand.hbm [shape: bf16[32,32], index: 2, kind: input, shape index: {}]   ;;  %s1036_s3 = inlined_call_operand.vmem [shape: bf16[16,32], index: 3, kind: input, shape index: {}]   ;;  %s1037_s4 = inlined_call_operand.vmem [shape: f32[1,32], index: 4, kind: input, shape index: {}]   ;;  %s1038_s5 = inlined_call_operand.vmem [shape: bf16[32,8], index: 5, kind: input, shape index: {}]   ;;  %s1039_s6 = inlined_call_operand.vmem [shape: f32[1,8], index: 6, kind: input, shape index: {}]   ;;  %s1040_s7 = inlined_call_operand.vmem [shape: f32[16,8], index: 7, kind: output, shape index: {}]  }
   0x1   :  { %14 = vsyncpa [#allocation3 + $0x1], 0 }
   0x2   :  { %15 = vsyncpa [#allocation5], 0  ;;  %s864_s24 = smov 0   ;;  %s866_s25 = smov 0  }
   0x3   :  { %s868_s26 = smov 0   ;;  %s870_s27 = smov 0  }
   0x4 LB: > { %s883_s28 = sadd.s32 4294967295, %s816_s27   ;;  %p67_p0 = scmp.ne.s32.totalorder %s808_s25, %s804_s24  ;;  %s816_s27 = sphi %s870_s27, %s1055_s27   ;;  %s812_s26 = sphi %s868_s26, %s1054_s26   ;;  %s808_s25 = sphi %s866_s25, %s1053_s25   ;;  %s804_s24 = sphi %s864_s24, %s1052_s24  }
   0x5   : > { %p1041_p1 = scmp.eq.s32.totalorder %s883_s28, 0  ;;  %p609_p2 = scmp.ge.s32.totalorder %s816_s27, 1 }
   0x6   : > { %p209_p3 = scmp.lt.s32.totalorder %s816_s27, 3  ;;  %s818_s8 = smov [#allocation4]  }
   0x7   : > { %p891_p4 = por %p1041_p1, %p67_p0  ;;  %s221_s9 = sshll.u32 %s818_s8, 4  ;;  %s222_s9 = int_to_ptr.vmem [resolvable:$true] %s221_s9 }
   0x8   : > { %p895_p5 = pnand %p609_p2, %p209_p3  ;;  %s908_s11 = sadd.s32 1, %s816_s27  }
   0x9   : > { %s1044_s29 = scalar_select %p891_p4, 1, 0 }
   0xa   : > { %s1045_s30 = scalar_select %p895_p5, 1, 0 }
   0xb   : > { %p667_p6 = pneg %p895_p5  ;;  %s54_s12 = sadd.s32 1, %s812_s26 }
   0xc   : > { %s51_s13 = ssub.s32 %s816_s27, %s908_s11  ;;  %s720_s16 = scalar_lea.hbm %s1035_s2, 256 }
   0xd   : > { %p903_p7 = pnand %p667_p6, %p1041_p1  ;;  %p721_p8 = scmp.ne.s32.totalorder %s1035_s2, %s720_s16 }
   0xe   : > { %p727_p12 = scmp.lt.u32.totalorder %s720_s16, %s1035_s2 }
   0xf   : > { %p722_p9 = pneg %p903_p7 }
  0x11   : > { %p723_p10 = pnand %p722_p9, %p721_p8 }
  0x13   : > { %p724_p11 = pneg %p723_p10 }
  0x15   : > { %p729_p13 = pnand %p727_p12, %p724_p11 }
  0x17   : > { %732 = shalt.err (!%p729_p13)
}
  0x18   : > { %s733_s21 = scalar_lea.vmem %s222_s9, 256  ;;  %p741_p6 = scmp.lt.s32.totalorder %s222_s9, %s222_s9 }
  0x19   : > { %p734_p0 = scmp.ne.s32.totalorder %s222_s9, %s733_s21  ;;  %p742_p1 = scmp.lt.s32.totalorder %s733_s21, %s733_s21 }
  0x1b   : > { %p736_p2 = pnand %p734_p0, %p722_p9  ;;  %p743_p4 = por %p742_p1, %p741_p6 }
  0x1d   : > { %p737_p3 = pneg %p736_p2 }
  0x1f   : > { %p744_p5 = pnand %p743_p4, %p737_p3 }
  0x21   : > { %747 = shalt.err (!%p744_p5)
}
  0x22   : > { %s819_s22 = smov 64   ;;  %s820_s23 = smov 4  }
  0x23   : > { %670 = dma.hbm_to_vmem [thread:$0]  (!%p903_p7), %s1035_s2, 256, %s222_s9, [#allocation5], %s819_s22, %s819_s22, %s820_s23  }
  0x24   : > { %p52_p8 = scmp.eq.s32.totalorder %s51_s13, 0  ;;  %p61_p9 = scmp.ne.s32.totalorder %s812_s26, %s808_s25 }
  0x25   : > { %p62_p1 = scmp.eq.s32.totalorder %s816_s27, 0  ;;  %p676_p4 = scmp.lt.s32.totalorder %s816_s27, 2 }
  0x26   : > { %s934_s14 = scalar_select %p52_p8, %s812_s26, %s54_s12  }
  0x27   : > { %p63_p5 = por %p62_p1, %p61_p9  ;;  %s254_s15 = sand.u32 1, %s812_s26  }
  0x28   : > { %s612_s16 = sshll.u32 %s254_s15, 3  ;;  %s613_s17 = sshll.u32 %s816_s27, 7 }
  0x29   : > { %s941_s20 = scalar_lea.hbm %s1034_s1, %s613_s17  ;;  %s258_s9 = scalar_lea.vmem [#allocation2], %s612_s16 }
  0x2a   : > { %s265_s10 = sshll.u32 %s258_s9, 4  ;;  %p945_p7 = pnand %p676_p4, %p63_p5  ;;  %s943_s10 = int_to_ptr.vmem [resolvable:$true] %s265_s10 }
  0x2b   : > { %s255_s27 = scalar_lea.sflag [#allocation3], %s254_s15  ;;  %s748_s13 = scalar_lea.hbm %s941_s20, 128 }
  0x2c   : > { %p749_p10 = scmp.ne.s32.totalorder %s941_s20, %s748_s13  ;;  %p750_p11 = pneg %p945_p7 }
  0x2d   : > { %s753_s23 = scalar_lea.hbm %s1034_s1, 256  ;;  %p754_p0 = scmp.lt.u32.totalorder %s941_s20, %s1034_s1 }
  0x2e   : > { %p751_p12 = pnand %p750_p11, %p749_p10  ;;  %p755_p2 = scmp.lt.u32.totalorder %s753_s23, %s748_s13 }
  0x2f   : > { %p757_p6 = scmp.lt.u32.totalorder %s748_s13, %s941_s20 }
  0x30   : > { %p752_p13 = pneg %p751_p12  ;;  %p756_p3 = por %p755_p2, %p754_p0 }
  0x32   : > { %p758_p8 = por %p757_p6, %p756_p3 }
  0x34   : > { %p759_p9 = pnand %p758_p8, %p752_p13 }
  0x36   : > { %762 = shalt.err (!%p759_p9)
}
  0x37   : > { %s763_s15 = scalar_lea.vmem %s943_s10, 128  ;;  %s821_s16 = smov [#allocation2]  }
  0x38   : > { %p764_p1 = scmp.ne.s32.totalorder %s943_s10, %s763_s15  ;;  %s768_s17 = sshll.u32 %s821_s16, 4  ;;  %s769_s17 = int_to_ptr.vmem [resolvable:$false] %s768_s17 }
  0x39   : > { %s770_s18 = scalar_lea.vmem %s769_s17, 256  ;;  %p771_p10 = scmp.lt.s32.totalorder %s943_s10, %s769_s17 }
  0x3a   : > { %p766_p4 = pnand %p764_p1, %p750_p11  ;;  %p772_p12 = scmp.lt.s32.totalorder %s770_s18, %s763_s15 }
  0x3c   : > { %p767_p5 = pneg %p766_p4  ;;  %p773_p0 = por %p772_p12, %p771_p10 }
  0x3e   : > { %p774_p2 = pnand %p773_p0, %p767_p5 }
  0x40   : > { %777 = shalt.err (!%p774_p2)
}
  0x41   : > { %674 = dma.hbm_to_vmem [thread:$0]  (!%p945_p7), %s941_s20, 128, %s943_s10, %s255_s27  }
  0x42   : > { %p1048_p13 = scmp.ne.s32.totalorder %s1045_s30, 0 }
  0x43   : > { %s276_s19 = sand.u32 (!%p1048_p13), 1, %s808_s25   ;;  %p1049_p11 = scmp.ne.s32.totalorder (!%p1048_p13), %s1044_s29, 0 }
  0x44   : > { %274 = sbr.rel (%p1048_p13) target bundleno = 524 (0x20c), region = 48  ;;  %s615_s9 = sshll.u32 (!%p1048_p13), %s276_s19, 3 }
  0x45   : > { %s277_s13 = scalar_lea.sflag (!%p1048_p13), [#allocation3], %s276_s19  ;;  %s280_s21 = scalar_lea.vmem (!%p1048_p13), [#allocation2], %s615_s9 }
  0x4b   : > { %795 = dma.done.wait (%p1049_p11), %s277_s13, 128  }
  0x4c   : > { %797 = vsyncadd (%p1049_p11), %s277_s13, 4294967168  ;;  %p1050_p3 = scmp.eq.s32.totalorder %s883_s28, 0 }
  0x4e   : > { %799 = dma.done.wait (%p1050_p3), [#allocation5], 256   ;;  %p1051_p6 = pmov %p1050_p3 }
  0x4f   : > { %p318_p7 = scmp.lt.s32.totalorder %s883_s28, 1  ;;  %v822_v0 = vmov 0.0   ;;  %vm823_vm0 = vmmov 0   ;;  %v715_v1 = vld [vmem:[#allocation4] sm:$0xff]   ;;  %v716_v2 = vld [vmem:[%s1036_s3] sm:$0xff]   ;;  %vm343_vm1 = vcmask 130048  }
  0x50   : > { %801 = vsyncadd (%p1051_p6), [#allocation5], 4294967040  ;;  %645 = vmatprep.subr.bf16.mxu1 %v822_v0  ;;  %639 = vmatprep.subr.bf16.mxu0 %v822_v0  ;;  %v329_v3 = vld [vmem:[%s280_s21] sm:$0xff]  ;;  %v717_v5 = vld [vmem:[#allocation4 + $0x8] sm:$0xff]   ;;  %vm399_vm2 = vcmask 261120   ;;  %vm519_vm3 = vcmask 64512  }
  0x51   : > { %641 = vmatprep.mubr.msk.bf16.mxu0 %vm823_vm0, %v822_v0  ;;  %649 = vmatprep.mubr.msk.bf16.mxu1 %vm823_vm0, %v822_v0  ;;  %s1057_s28 = smov (!%p318_p7, %s883_s28), 1  ;;  %v330_v4 = vpack.c.bf16 %v329_v3, %v329_v3  ;;  %v718_v8 = vld [vmem:[%s1038_s5] sm:$0xff]   ;;  %v719_v9 = vld [vmem:[%s1038_s5 + $0x8] sm:$0xff]  }
  0x52   : > { %s617_s29 = sshll.u32 %s1057_s28, 3  ;;  %646 = vmatpush3.bf16.msra.mxu1 %v715_v1  ;;  %640 = vmatpush3.bf16.msra.mxu0 %v716_v2  ;;  %v624_v15 = vld [vmem:[%s1037_s4] ss:$0 sm:$0xff] }
  0x53   : > { %s321_s10 = scalar_lea.vmem %s1033_s0, %s617_s29  ;;  %647 = vmatprep.subr.bf16.mxu1 %v822_v0  ;;  %653 = vmatprep.subr.bf16.mxu0 %v822_v0  ;;  %v625_v23 = vld [vmem:[%s1039_s6] ss:$0 sm:$0xff]  ;;  %s325_s13 = scalar_lea.vmem %s1040_s7, %s617_s29 }
  0x54   : > { %v327_v6 = vld [vmem:[%s321_s10] sm:$0xff] }
  0x55   : > { %v328_v7 = vpack.c.bf16 %v327_v6, %v327_v6  ;;  %642 = vmatmul.mubr.msk.bf16.vlgmr.msra.gmra.mrb[0].mxu0 %vm343_vm1, %v330_v4 }
  0x56   : > { %648 = vmatpush3.bf16.msra.mxu1 %v717_v5  ;;  %657 = vmatprep.mubr.msk.bf16.mxu0 %vm823_vm0, %v822_v0 }
  0x57   : > { %654 = vmatpush3.bf16.msra.mxu0 %v718_v8 }
  0x58   : > { %655 = vmatprep.subr.bf16.mxu0 %v822_v0 }
  0x59   : > { %650 = vmatmul.mubr.msk.bf16.vlgmr.msra.gmra.mrb[0].mxu1 %vm399_vm2, %v328_v7 }
  0x5b   : > { %656 = vmatpush3.bf16.msra.mxu0 %v719_v9 }
 0x128   : > { %v381_v10 = vpop.f32.mrb[0].mxu0 }
 0x129   : > { %v643_v11 = vpop.f32.mrb[1].mxu0 }
 0x12a   : > { %v384_v12 = vpop.f32.mrb[2].mxu0 }
 0x12b   : > { %v644_v13 = vpop.f32.mrb[3].mxu0 }
 0x12c   : > { %v437_v14 = vpop.f32.mrb[0].mxu1 }
 0x12d   : > { %v438_v16 = vadd.f32 %v437_v14, %v381_v10  ;;  %v651_v17 = vpop.f32.mrb[1].mxu1 }
 0x12e   : > { %v440_v18 = vpop.f32.mrb[2].mxu1 }
 0x12f   : > { %v450_v19 = vadd.f32 %v624_v15, %v438_v16  ;;  %v652_v20 = vpop.f32.mrb[3].mxu1 }
 0x131   : > { %v451_v21 = vmax.f32 %v450_v19, 0.0 }
 0x133   : > { %v452_v22 = vpack.c.bf16 %v451_v21, %v451_v21 }
 0x135   : > { %658 = vmatmul.mubr.msk.bf16.vlgmr.msra.gmra.mrb[4].mxu0 %vm399_vm2, %v452_v22 }
 0x208   : > { %v513_v24 = vpop.f32.mrb[4].mxu0 }
 0x209   : > { %v514_v25 = vadd.f32 %v625_v23, %v513_v24  ;;  %v659_v26 = vpop.f32.mrb[5].mxu0 }
 0x20a   : > { %v516_v27 = vpop.f32.mrb[6].mxu0 }
 0x20b   : > { %520 = vst.msk [vmem:[%s325_s13] sm:$0xff] %vm519_vm3, %v514_v25  ;;  %v660_v28 = vpop.f32.mrb[7].mxu0 }
 0x20c PF: > { %p18_p8 = scmp.ge.s32.totalorder %s908_s11, 4   ;;  %s1052_s24 = smov %s808_s25 }
 0x20d   : > { %s1053_s25 = smov %s812_s26  ;;  %s1054_s26 = smov %s934_s14 }
 0x20e   : > { %s1055_s27 = smov %s908_s11  ;;  %20 = sbr.rel (!%p18_p8) target bundleno = 4 (0x4), region = 95 }
 0x215   :  { %540 = vsyncpa [#allocation3], 1 }
 0x216   :  { %542 = vsyncpa [#allocation3 + $0x1], 1 }
 0x217   :  { %543 = vsyncpa [#allocation5], 1 }

</bundles_post_ra>
